<compile_context>
chip_gen: v5e
topology: v5e:2x2
jax: 0.10.0
libtpu: 0.0.40
codegen_flags: <defaults>
</compile_context>

<pallas_src>
import jax
import jax.numpy as jnp
from jax.experimental import pallas as pl
from jax.experimental.pallas import tpu as pltpu

NEG_INF = -1e30


def _gat_kernel(x_ref, mask_ref,
                w1_ref, as1_ref, ad1_ref, bm1_ref, b1_ref,
                w2_ref, as2_ref, ad2_ref, bm2_ref, b2_ref,
                wfc_ref, bfc_ref,
                out_ref):
    """One graph per grid step: GATConv -> ReLU -> GATConv -> add_pool -> fc."""
    n = x_ref.shape[0]
    # Additive attention bias: 0 on edges (incl. self-loops), -1e30 elsewhere.
    # Self-loops guarantee every row has at least one unmasked entry, so the
    # max-subtracted softmax never degenerates (see correctness note).
    mask = mask_ref[...]                                          # [N, N] f32

    def gat_layer(feat, w_ref, as_ref, ad_ref, bm_ref):
        hc = w_ref.shape[1]
        heads = ad_ref.shape[1]
        # Feature transform for all heads at once.
        xw = jnp.dot(feat, w_ref[...],
                     preferred_element_type=jnp.float32)          # [N, H*C]
        # Attention logits:
        #   d[i, h] = <xw_i|_h, a_dst_h>   -> natural [N, H] layout
        #   s[h, j] = <xw_j|_h, a_src_h>   -> [H, N]: heads on sublanes, nodes
        #     on lanes, so s[h:h+1, :] row-broadcasts with no in-kernel
        #     transpose (merging both into one matmul would force an [N,H]->
        #     [H,N] relayout that costs what the saved MXU push saves).
        d = jnp.dot(xw, ad_ref[...],
                    preferred_element_type=jnp.float32)           # [N, H]
        s = jax.lax.dot_general(as_ref[...], xw,
                                dimension_numbers=(((1,), (1,)), ((), ())),
                                preferred_element_type=jnp.float32)  # [H, N]
        alphas = []
        for h in range(heads):                                    # static loop (H=4)
            e = d[:, h:h + 1] + s[h:h + 1, :]                     # [N, N]
            e = jnp.where(e > 0.0, e, 0.2 * e)                    # LeakyReLU(0.2)
            e = e + mask                                          # non-edges -> -1e30
            e = e - jnp.max(e, axis=-1, keepdims=True)            # stable softmax
            p = jnp.exp(e)                                        # masked -> exactly 0
            alphas.append(p / jnp.sum(p, axis=-1, keepdims=True))
        # Lane-concatenated attention: alpha_blk[:, h*N:(h+1)*N] = alpha_h.
        alpha_blk = jnp.concatenate(alphas, axis=1)               # [N, H*N]
        # Head-stacked block-diagonal features:
        #   xw_blk[h*N + i, h*C:(h+1)*C] = xw[i, h*C:(h+1)*C], zeros elsewhere,
        # so a single MXU matmul does all heads' aggregation at once.
        xw_blk = (jnp.broadcast_to(xw[None, :, :], (heads, n, hc))
                  .reshape(heads * n, hc) * bm_ref[...])          # [H*N, H*C]
        return alpha_blk, xw_blk

    # ---------------- conv1 (heads concat) + bias + ReLU ----------------
    alpha1, xw1_blk = gat_layer(x_ref[...], w1_ref, as1_ref, ad1_ref, bm1_ref)
    h1 = jnp.dot(alpha1, xw1_blk,
                 preferred_element_type=jnp.float32)              # [N, 128]
    h1 = jnp.maximum(h1 + b1_ref[...], 0.0)

    # --------- conv2 fused with global_add_pool (single graph) ----------
    #   pool(alpha_h @ xw2_h) = colsum(alpha_h) @ xw2_h ; pool(+b2) = N * b2
    alpha2, xw2_blk = gat_layer(h1, w2_ref, as2_ref, ad2_ref, bm2_ref)
    col = jnp.sum(alpha2, axis=0, keepdims=True)                  # [1, H*N]
    pooled = (jnp.dot(col, xw2_blk, preferred_element_type=jnp.float32)
              + jnp.float32(n) * b2_ref[...])                     # [1, 64]

    # -------------------------------- fc --------------------------------
    out_ref[...] = (jnp.dot(pooled, wfc_ref[...],
                            preferred_element_type=jnp.float32)
                    + bfc_ref[...])                               # [1, 2]


def _attn_block_diag(a_src, a_dst):
    """[H, C] attention vectors -> block-diagonal matmul operands.

    as_blk[h, h*C:(h+1)*C] = a_src[h]   ([H, H*C]; contracted vs xw features -> [H, N])
    ad_blk[h*C:(h+1)*C, h] = a_dst[h]   ([H*C, H]; xw @ ad_blk -> [N, H])
    """
    h, c = a_src.shape
    eye = jnp.eye(h, dtype=jnp.float32)
    as_blk = (eye[:, :, None] * a_src[None, :, :]).reshape(h, h * c)
    ad_blk = (a_dst[:, :, None] * eye[:, None, :]).reshape(h * c, h)
    return as_blk, ad_blk


def _head_block_mask(heads, n, c):
    """[H*N, H*C] mask selecting head h's channel slab for head h's row slab."""
    return jnp.kron(jnp.eye(heads, dtype=jnp.float32),
                    jnp.ones((n, c), dtype=jnp.float32))


def build_adj_mask(edge_index, num_nodes):
    """Additive attention bias: 0 where edge j->i exists (self-loops added,
    matching PyG GATConv add_self_loops=True), -1e30 elsewhere.  Built with a
    one-hot matmul (no serial XLA scatter).  NOTE: duplicate edges collapse to
    a single entry; PyG counts multi-edges separately in the softmax."""
    src, tgt = edge_index[0], edge_index[1]
    oh_t = jax.nn.one_hot(tgt, num_nodes, dtype=jnp.float32)      # [E, N]
    oh_s = jax.nn.one_hot(src, num_nodes, dtype=jnp.float32)      # [E, N]
    adj = jnp.dot(oh_t.T, oh_s) + jnp.eye(num_nodes, dtype=jnp.float32)
    return jnp.where(adj > 0.0, 0.0, NEG_INF).astype(jnp.float32)


def gat_classifier_forward(params, x, mask_bias):
    """Batched forward.

    x:         [G, N, F]  node features for G same-sized graphs.
    mask_bias: [G, N, N]  additive attention bias from build_adj_mask.
    returns    [G, 2]     per-graph logits.
    """
    g, n, _ = x.shape
    h1 = params["as1"].shape[0]
    h2 = params["as2"].shape[0]
    c1 = params["w1"].shape[1] // h1
    c2 = params["w2"].shape[1] // h2
    ncls = params["wfc"].shape[1]

    as1, ad1 = _attn_block_diag(params["as1"], params["ad1"])
    as2, ad2 = _attn_block_diag(params["as2"], params["ad2"])
    bm1 = _head_block_mask(h1, n, c1)                 # [H1*N, H1*C1]
    bm2 = _head_block_mask(h2, n, c2)                 # [H2*N, H2*C2]

    weights = (params["w1"], as1, ad1, bm1, params["b1"],
               params["w2"], as2, ad2, bm2, params["b2"],
               params["wfc"], params["bfc"])

    def graph_spec(shape):
        # per-graph block: squeeze the leading graph dim, full trailing dims
        return pl.BlockSpec((None,) + tuple(shape[1:]),
                            lambda i: (i,) + (0,) * (len(shape) - 1))

    def const_spec(a):
        # weights: constant index map -> DMA'd once, VMEM-resident across grid
        return pl.BlockSpec(a.shape, lambda i: (0,) * a.ndim)

    out = pl.pallas_call(
        _gat_kernel,
        grid=(g,),
        out_shape=jax.ShapeDtypeStruct((g, 1, ncls), jnp.float32),
        in_specs=[graph_spec(x.shape), graph_spec(mask_bias.shape)]
                 + [const_spec(w) for w in weights],
        out_specs=pl.BlockSpec((None, 1, ncls), lambda i: (i, 0, 0)),
        compiler_params=pltpu.CompilerParams(
            dimension_semantics=("parallel",)),
    )(x, mask_bias, *weights)
    return out.reshape(g, ncls)


def init_params(key, num_features):
    """Deterministic (glorot-uniform-ish) init matching GATClassifier shapes."""
    def glorot(k, shape):
        fan_in, fan_out = shape[-2], shape[-1]
        lim = (6.0 / (fan_in + fan_out)) ** 0.5
        return jax.random.uniform(k, shape, jnp.float32, -lim, lim)

    ks = jax.random.split(key, 8)
    h1, c1 = 4, 32          # conv1: GATConv(num_features, 32, heads=4)
    h2, c2 = 4, 16          # conv2: GATConv(128, 16, heads=4)
    return dict(
        w1=glorot(ks[0], (num_features, h1 * c1)),
        as1=glorot(ks[1], (h1, c1)),
        ad1=glorot(ks[2], (h1, c1)),
        b1=jnp.zeros((1, h1 * c1), jnp.float32),
        w2=glorot(ks[3], (h1 * c1, h2 * c2)),
        as2=glorot(ks[4], (h2, c2)),
        ad2=glorot(ks[5], (h2, c2)),
        b2=jnp.zeros((1, h2 * c2), jnp.float32),
        wfc=glorot(ks[6], (h2 * c2, 2)),          # Linear(64, 2) weight^T
        bfc=jax.random.uniform(ks[7], (1, 2), jnp.float32, -0.1, 0.1),
    )


if __name__ == "__main__":
    key = jax.random.PRNGKey(0)
    k_x, k_p = jax.random.split(key)

    num_graphs, num_nodes, num_features = 8, 8, 16
    x = jax.random.normal(k_x, (num_graphs, num_nodes, num_features), jnp.float32)

    # deterministic bidirectional ring graph: i <-> (i+1) mod N, E = 16 edges,
    # shared by every graph in the batch (features differ per graph)
    fwd_src = jnp.arange(num_nodes, dtype=jnp.int32)
    fwd_tgt = (fwd_src + 1) % num_nodes
    edge_index = jnp.stack([jnp.concatenate([fwd_src, fwd_tgt]),
                            jnp.concatenate([fwd_tgt, fwd_src])], axis=0)
    mask_one = build_adj_mask(edge_index, num_nodes)              # [N, N]
    mask_bias = jnp.broadcast_to(mask_one[None],
                                 (num_graphs, num_nodes, num_nodes))

    params = init_params(k_p, num_features)

    fwd_fn = jax.jit(gat_classifier_forward)
    out = jax.block_until_ready(fwd_fn(params, x, mask_bias))
    assert out.shape == (num_graphs, 2) and bool(jnp.all(jnp.isfinite(out)))
    print("KERNEL_OK")
</pallas_src>

<mosaic_0001>
module attributes {stable_mosaic.version = 11 : i64} {
  func.func @_gat_kernel(%arg0: i32, %arg1: memref<1x8x16xf32, #tpu.memory_space<vmem>>, %arg2: memref<1x8x8xf32, #tpu.memory_space<vmem>>, %arg3: memref<16x128xf32, #tpu.memory_space<vmem>>, %arg4: memref<4x128xf32, #tpu.memory_space<vmem>>, %arg5: memref<128x4xf32, #tpu.memory_space<vmem>>, %arg6: memref<32x128xf32, #tpu.memory_space<vmem>>, %arg7: memref<1x128xf32, #tpu.memory_space<vmem>>, %arg8: memref<128x64xf32, #tpu.memory_space<vmem>>, %arg9: memref<4x64xf32, #tpu.memory_space<vmem>>, %arg10: memref<64x4xf32, #tpu.memory_space<vmem>>, %arg11: memref<32x64xf32, #tpu.memory_space<vmem>>, %arg12: memref<1x64xf32, #tpu.memory_space<vmem>>, %arg13: memref<64x2xf32, #tpu.memory_space<vmem>>, %arg14: memref<1x2xf32, #tpu.memory_space<vmem>>, %arg15: memref<1x1x2xf32, #tpu.memory_space<vmem>>) attributes {dimension_semantics = [#tpu.dimension_semantics<parallel>], iteration_bounds = array<i64: 8>, scalar_prefetch = 0 : i64, scratch_operands = 0 : i64, tpu.core_type = #tpu.core_type<tc>, window_params = [{transform_indices = @transform_0, window_bounds = array<i64: 1, 8, 16>}, {transform_indices = @transform_1, window_bounds = array<i64: 1, 8, 8>}, {pipeline_mode = #tpu.pipeline_mode<synchronous>, transform_indices = @transform_2, window_bounds = array<i64: 16, 128>}, {pipeline_mode = #tpu.pipeline_mode<synchronous>, transform_indices = @transform_3, window_bounds = array<i64: 4, 128>}, {pipeline_mode = #tpu.pipeline_mode<synchronous>, transform_indices = @transform_4, window_bounds = array<i64: 128, 4>}, {pipeline_mode = #tpu.pipeline_mode<synchronous>, transform_indices = @transform_5, window_bounds = array<i64: 32, 128>}, {pipeline_mode = #tpu.pipeline_mode<synchronous>, transform_indices = @transform_6, window_bounds = array<i64: 1, 128>}, {pipeline_mode = #tpu.pipeline_mode<synchronous>, transform_indices = @transform_7, window_bounds = array<i64: 128, 64>}, {pipeline_mode = #tpu.pipeline_mode<synchronous>, transform_indices = @transform_8, window_bounds = array<i64: 4, 64>}, {pipeline_mode = #tpu.pipeline_mode<synchronous>, transform_indices = @transform_9, window_bounds = array<i64: 64, 4>}, {pipeline_mode = #tpu.pipeline_mode<synchronous>, transform_indices = @transform_10, window_bounds = array<i64: 32, 64>}, {pipeline_mode = #tpu.pipeline_mode<synchronous>, transform_indices = @transform_11, window_bounds = array<i64: 1, 64>}, {pipeline_mode = #tpu.pipeline_mode<synchronous>, transform_indices = @transform_12, window_bounds = array<i64: 64, 2>}, {pipeline_mode = #tpu.pipeline_mode<synchronous>, transform_indices = @transform_13, window_bounds = array<i64: 1, 2>}, {transform_indices = @transform_14, window_bounds = array<i64: 1, 1, 2>}]} {
    %c0 = arith.constant 0 : index
    %c0_0 = arith.constant 0 : index
    %c0_1 = arith.constant 0 : index
    %0 = vector.load %arg2[%c0, %c0_0, %c0_1] : memref<1x8x8xf32, #tpu.memory_space<vmem>>, vector<1x8x8xf32>
    %1 = vector.shape_cast %0 : vector<1x8x8xf32> to vector<8x8xf32>
    %c0_2 = arith.constant 0 : index
    %c0_3 = arith.constant 0 : index
    %c0_4 = arith.constant 0 : index
    %2 = vector.load %arg1[%c0_2, %c0_3, %c0_4] : memref<1x8x16xf32, #tpu.memory_space<vmem>>, vector<1x8x16xf32>
    %3 = vector.shape_cast %2 : vector<1x8x16xf32> to vector<8x16xf32>
    %c0_5 = arith.constant 0 : index
    %c0_6 = arith.constant 0 : index
    %4 = vector.load %arg3[%c0_5, %c0_6] : memref<16x128xf32, #tpu.memory_space<vmem>>, vector<16x128xf32>
    %cst = arith.constant dense<0.000000e+00> : vector<8x128xf32>
    %5 = tpu.matmul %3, %4, %cst {dimension_numbers = #tpu.dot_dimension_numbers<[1], [0], [0], [1], [0, 0, 1, 1], [], []>} : vector<8x16xf32>, vector<16x128xf32>, vector<8x128xf32> -> vector<8x128xf32>
    %c0_7 = arith.constant 0 : index
    %c0_8 = arith.constant 0 : index
    %6 = vector.load %arg5[%c0_7, %c0_8] : memref<128x4xf32, #tpu.memory_space<vmem>>, vector<128x4xf32>
    %cst_9 = arith.constant dense<0.000000e+00> : vector<8x4xf32>
    %7 = tpu.matmul %5, %6, %cst_9 {dimension_numbers = #tpu.dot_dimension_numbers<[1], [0], [0], [1], [0, 0, 1, 1], [], []>} : vector<8x128xf32>, vector<128x4xf32>, vector<8x4xf32> -> vector<8x4xf32>
    %c0_10 = arith.constant 0 : index
    %c0_11 = arith.constant 0 : index
    %8 = vector.load %arg4[%c0_10, %c0_11] : memref<4x128xf32, #tpu.memory_space<vmem>>, vector<4x128xf32>
    %cst_12 = arith.constant dense<0.000000e+00> : vector<4x8xf32>
    %9 = tpu.matmul %8, %5, %cst_12 {dimension_numbers = #tpu.dot_dimension_numbers<[1], [1], [0], [0], [0, 0, 1, 0], [], []>} : vector<4x128xf32>, vector<8x128xf32>, vector<4x8xf32> -> vector<4x8xf32>
    %10 = vector.extract_strided_slice %7 {offsets = [0, 0], sizes = [8, 1], strides = [1, 1]} : vector<8x4xf32> to vector<8x1xf32>
    %11 = vector.extract_strided_slice %9 {offsets = [0, 0], sizes = [1, 8], strides = [1, 1]} : vector<4x8xf32> to vector<1x8xf32>
    %12 = vector.broadcast %10 : vector<8x1xf32> to vector<8x8xf32>
    %13 = vector.broadcast %11 : vector<1x8xf32> to vector<8x8xf32>
    %14 = arith.addf %12, %13 : vector<8x8xf32>
    %cst_13 = arith.constant 0.000000e+00 : f32
    %15 = vector.broadcast %cst_13 : f32 to vector<8x8xf32>
    %16 = arith.cmpf ogt, %14, %15 : vector<8x8xf32>
    %cst_14 = arith.constant 2.000000e-01 : f32
    %17 = vector.broadcast %cst_14 : f32 to vector<8x8xf32>
    %18 = arith.mulf %17, %14 : vector<8x8xf32>
    %19 = arith.select %16, %14, %18 : vector<8x8xi1>, vector<8x8xf32>
    %20 = arith.addf %19, %1 : vector<8x8xf32>
    %cst_15 = arith.constant dense<0xFF800000> : vector<8xf32>
    %21 = vector.multi_reduction <maximumf>, %20, %cst_15 [1] : vector<8x8xf32> to vector<8xf32>
    %22 = vector.shape_cast %21 : vector<8xf32> to vector<8x1xf32>
    %23 = vector.broadcast %22 : vector<8x1xf32> to vector<8x8xf32>
    %24 = arith.subf %20, %23 : vector<8x8xf32>
    %25 = math.exp %24 : vector<8x8xf32>
    %cst_16 = arith.constant dense<0.000000e+00> : vector<8xf32>
    %26 = vector.multi_reduction <add>, %25, %cst_16 [1] : vector<8x8xf32> to vector<8xf32>
    %27 = vector.shape_cast %26 : vector<8xf32> to vector<8x1xf32>
    %28 = vector.broadcast %27 : vector<8x1xf32> to vector<8x8xf32>
    %29 = arith.divf %25, %28 : vector<8x8xf32>
    %30 = vector.extract_strided_slice %7 {offsets = [0, 1], sizes = [8, 1], strides = [1, 1]} : vector<8x4xf32> to vector<8x1xf32>
    %31 = vector.extract_strided_slice %9 {offsets = [1, 0], sizes = [1, 8], strides = [1, 1]} : vector<4x8xf32> to vector<1x8xf32>
    %32 = vector.broadcast %30 : vector<8x1xf32> to vector<8x8xf32>
    %33 = vector.broadcast %31 : vector<1x8xf32> to vector<8x8xf32>
    %34 = arith.addf %32, %33 : vector<8x8xf32>
    %cst_17 = arith.constant 0.000000e+00 : f32
    %35 = vector.broadcast %cst_17 : f32 to vector<8x8xf32>
    %36 = arith.cmpf ogt, %34, %35 : vector<8x8xf32>
    %cst_18 = arith.constant 2.000000e-01 : f32
    %37 = vector.broadcast %cst_18 : f32 to vector<8x8xf32>
    %38 = arith.mulf %37, %34 : vector<8x8xf32>
    %39 = arith.select %36, %34, %38 : vector<8x8xi1>, vector<8x8xf32>
    %40 = arith.addf %39, %1 : vector<8x8xf32>
    %cst_19 = arith.constant dense<0xFF800000> : vector<8xf32>
    %41 = vector.multi_reduction <maximumf>, %40, %cst_19 [1] : vector<8x8xf32> to vector<8xf32>
    %42 = vector.shape_cast %41 : vector<8xf32> to vector<8x1xf32>
    %43 = vector.broadcast %42 : vector<8x1xf32> to vector<8x8xf32>
    %44 = arith.subf %40, %43 : vector<8x8xf32>
    %45 = math.exp %44 : vector<8x8xf32>
    %cst_20 = arith.constant dense<0.000000e+00> : vector<8xf32>
    %46 = vector.multi_reduction <add>, %45, %cst_20 [1] : vector<8x8xf32> to vector<8xf32>
    %47 = vector.shape_cast %46 : vector<8xf32> to vector<8x1xf32>
    %48 = vector.broadcast %47 : vector<8x1xf32> to vector<8x8xf32>
    %49 = arith.divf %45, %48 : vector<8x8xf32>
    %50 = vector.extract_strided_slice %7 {offsets = [0, 2], sizes = [8, 1], strides = [1, 1]} : vector<8x4xf32> to vector<8x1xf32>
    %51 = vector.extract_strided_slice %9 {offsets = [2, 0], sizes = [1, 8], strides = [1, 1]} : vector<4x8xf32> to vector<1x8xf32>
    %52 = vector.broadcast %50 : vector<8x1xf32> to vector<8x8xf32>
    %53 = vector.broadcast %51 : vector<1x8xf32> to vector<8x8xf32>
    %54 = arith.addf %52, %53 : vector<8x8xf32>
    %cst_21 = arith.constant 0.000000e+00 : f32
    %55 = vector.broadcast %cst_21 : f32 to vector<8x8xf32>
    %56 = arith.cmpf ogt, %54, %55 : vector<8x8xf32>
    %cst_22 = arith.constant 2.000000e-01 : f32
    %57 = vector.broadcast %cst_22 : f32 to vector<8x8xf32>
    %58 = arith.mulf %57, %54 : vector<8x8xf32>
    %59 = arith.select %56, %54, %58 : vector<8x8xi1>, vector<8x8xf32>
    %60 = arith.addf %59, %1 : vector<8x8xf32>
    %cst_23 = arith.constant dense<0xFF800000> : vector<8xf32>
    %61 = vector.multi_reduction <maximumf>, %60, %cst_23 [1] : vector<8x8xf32> to vector<8xf32>
    %62 = vector.shape_cast %61 : vector<8xf32> to vector<8x1xf32>
    %63 = vector.broadcast %62 : vector<8x1xf32> to vector<8x8xf32>
    %64 = arith.subf %60, %63 : vector<8x8xf32>
    %65 = math.exp %64 : vector<8x8xf32>
    %cst_24 = arith.constant dense<0.000000e+00> : vector<8xf32>
    %66 = vector.multi_reduction <add>, %65, %cst_24 [1] : vector<8x8xf32> to vector<8xf32>
    %67 = vector.shape_cast %66 : vector<8xf32> to vector<8x1xf32>
    %68 = vector.broadcast %67 : vector<8x1xf32> to vector<8x8xf32>
    %69 = arith.divf %65, %68 : vector<8x8xf32>
    %70 = vector.extract_strided_slice %7 {offsets = [0, 3], sizes = [8, 1], strides = [1, 1]} : vector<8x4xf32> to vector<8x1xf32>
    %71 = vector.extract_strided_slice %9 {offsets = [3, 0], sizes = [1, 8], strides = [1, 1]} : vector<4x8xf32> to vector<1x8xf32>
    %72 = vector.broadcast %70 : vector<8x1xf32> to vector<8x8xf32>
    %73 = vector.broadcast %71 : vector<1x8xf32> to vector<8x8xf32>
    %74 = arith.addf %72, %73 : vector<8x8xf32>
    %cst_25 = arith.constant 0.000000e+00 : f32
    %75 = vector.broadcast %cst_25 : f32 to vector<8x8xf32>
    %76 = arith.cmpf ogt, %74, %75 : vector<8x8xf32>
    %cst_26 = arith.constant 2.000000e-01 : f32
    %77 = vector.broadcast %cst_26 : f32 to vector<8x8xf32>
    %78 = arith.mulf %77, %74 : vector<8x8xf32>
    %79 = arith.select %76, %74, %78 : vector<8x8xi1>, vector<8x8xf32>
    %80 = arith.addf %79, %1 : vector<8x8xf32>
    %cst_27 = arith.constant dense<0xFF800000> : vector<8xf32>
    %81 = vector.multi_reduction <maximumf>, %80, %cst_27 [1] : vector<8x8xf32> to vector<8xf32>
    %82 = vector.shape_cast %81 : vector<8xf32> to vector<8x1xf32>
    %83 = vector.broadcast %82 : vector<8x1xf32> to vector<8x8xf32>
    %84 = arith.subf %80, %83 : vector<8x8xf32>
    %85 = math.exp %84 : vector<8x8xf32>
    %cst_28 = arith.constant dense<0.000000e+00> : vector<8xf32>
    %86 = vector.multi_reduction <add>, %85, %cst_28 [1] : vector<8x8xf32> to vector<8xf32>
    %87 = vector.shape_cast %86 : vector<8xf32> to vector<8x1xf32>
    %88 = vector.broadcast %87 : vector<8x1xf32> to vector<8x8xf32>
    %89 = arith.divf %85, %88 : vector<8x8xf32>
    %90 = tpu.concatenate %29, %49, %69, %89 in 1 : vector<8x8xf32>, vector<8x8xf32>, vector<8x8xf32>, vector<8x8xf32> -> vector<8x32xf32>
    %91 = vector.shape_cast %5 : vector<8x128xf32> to vector<1x8x128xf32>
    %92 = vector.shape_cast %91 : vector<1x8x128xf32> to vector<1x8x128xf32>
    %93 = vector.broadcast %92 : vector<1x8x128xf32> to vector<4x8x128xf32>
    %94 = vector.shape_cast %93 : vector<4x8x128xf32> to vector<32x128xf32>
    %c0_29 = arith.constant 0 : index
    %c0_30 = arith.constant 0 : index
    %95 = vector.load %arg6[%c0_29, %c0_30] : memref<32x128xf32, #tpu.memory_space<vmem>>, vector<32x128xf32>
    %96 = arith.mulf %94, %95 : vector<32x128xf32>
    %cst_31 = arith.constant dense<0.000000e+00> : vector<8x128xf32>
    %97 = tpu.matmul %90, %96, %cst_31 {dimension_numbers = #tpu.dot_dimension_numbers<[1], [0], [0], [1], [0, 0, 1, 1], [], []>} : vector<8x32xf32>, vector<32x128xf32>, vector<8x128xf32> -> vector<8x128xf32>
    %c0_32 = arith.constant 0 : index
    %c0_33 = arith.constant 0 : index
    %98 = vector.load %arg7[%c0_32, %c0_33] : memref<1x128xf32, #tpu.memory_space<vmem>>, vector<1x128xf32>
    %99 = vector.broadcast %98 : vector<1x128xf32> to vector<8x128xf32>
    %100 = arith.addf %97, %99 : vector<8x128xf32>
    %cst_34 = arith.constant 0.000000e+00 : f32
    %101 = vector.broadcast %cst_34 : f32 to vector<8x128xf32>
    %102 = arith.maximumf %100, %101 : vector<8x128xf32>
    %c0_35 = arith.constant 0 : index
    %c0_36 = arith.constant 0 : index
    %103 = vector.load %arg8[%c0_35, %c0_36] : memref<128x64xf32, #tpu.memory_space<vmem>>, vector<128x64xf32>
    %cst_37 = arith.constant dense<0.000000e+00> : vector<8x64xf32>
    %104 = tpu.matmul %102, %103, %cst_37 {dimension_numbers = #tpu.dot_dimension_numbers<[1], [0], [0], [1], [0, 0, 1, 1], [], []>} : vector<8x128xf32>, vector<128x64xf32>, vector<8x64xf32> -> vector<8x64xf32>
    %c0_38 = arith.constant 0 : index
    %c0_39 = arith.constant 0 : index
    %105 = vector.load %arg10[%c0_38, %c0_39] : memref<64x4xf32, #tpu.memory_space<vmem>>, vector<64x4xf32>
    %cst_40 = arith.constant dense<0.000000e+00> : vector<8x4xf32>
    %106 = tpu.matmul %104, %105, %cst_40 {dimension_numbers = #tpu.dot_dimension_numbers<[1], [0], [0], [1], [0, 0, 1, 1], [], []>} : vector<8x64xf32>, vector<64x4xf32>, vector<8x4xf32> -> vector<8x4xf32>
    %c0_41 = arith.constant 0 : index
    %c0_42 = arith.constant 0 : index
    %107 = vector.load %arg9[%c0_41, %c0_42] : memref<4x64xf32, #tpu.memory_space<vmem>>, vector<4x64xf32>
    %cst_43 = arith.constant dense<0.000000e+00> : vector<4x8xf32>
    %108 = tpu.matmul %107, %104, %cst_43 {dimension_numbers = #tpu.dot_dimension_numbers<[1], [1], [0], [0], [0, 0, 1, 0], [], []>} : vector<4x64xf32>, vector<8x64xf32>, vector<4x8xf32> -> vector<4x8xf32>
    %109 = vector.extract_strided_slice %106 {offsets = [0, 0], sizes = [8, 1], strides = [1, 1]} : vector<8x4xf32> to vector<8x1xf32>
    %110 = vector.extract_strided_slice %108 {offsets = [0, 0], sizes = [1, 8], strides = [1, 1]} : vector<4x8xf32> to vector<1x8xf32>
    %111 = vector.broadcast %109 : vector<8x1xf32> to vector<8x8xf32>
    %112 = vector.broadcast %110 : vector<1x8xf32> to vector<8x8xf32>
    %113 = arith.addf %111, %112 : vector<8x8xf32>
    %cst_44 = arith.constant 0.000000e+00 : f32
    %114 = vector.broadcast %cst_44 : f32 to vector<8x8xf32>
    %115 = arith.cmpf ogt, %113, %114 : vector<8x8xf32>
    %cst_45 = arith.constant 2.000000e-01 : f32
    %116 = vector.broadcast %cst_45 : f32 to vector<8x8xf32>
    %117 = arith.mulf %116, %113 : vector<8x8xf32>
    %118 = arith.select %115, %113, %117 : vector<8x8xi1>, vector<8x8xf32>
    %119 = arith.addf %118, %1 : vector<8x8xf32>
    %cst_46 = arith.constant dense<0xFF800000> : vector<8xf32>
    %120 = vector.multi_reduction <maximumf>, %119, %cst_46 [1] : vector<8x8xf32> to vector<8xf32>
    %121 = vector.shape_cast %120 : vector<8xf32> to vector<8x1xf32>
    %122 = vector.broadcast %121 : vector<8x1xf32> to vector<8x8xf32>
    %123 = arith.subf %119, %122 : vector<8x8xf32>
    %124 = math.exp %123 : vector<8x8xf32>
    %cst_47 = arith.constant dense<0.000000e+00> : vector<8xf32>
    %125 = vector.multi_reduction <add>, %124, %cst_47 [1] : vector<8x8xf32> to vector<8xf32>
    %126 = vector.shape_cast %125 : vector<8xf32> to vector<8x1xf32>
    %127 = vector.broadcast %126 : vector<8x1xf32> to vector<8x8xf32>
    %128 = arith.divf %124, %127 : vector<8x8xf32>
    %129 = vector.extract_strided_slice %106 {offsets = [0, 1], sizes = [8, 1], strides = [1, 1]} : vector<8x4xf32> to vector<8x1xf32>
    %130 = vector.extract_strided_slice %108 {offsets = [1, 0], sizes = [1, 8], strides = [1, 1]} : vector<4x8xf32> to vector<1x8xf32>
    %131 = vector.broadcast %129 : vector<8x1xf32> to vector<8x8xf32>
    %132 = vector.broadcast %130 : vector<1x8xf32> to vector<8x8xf32>
    %133 = arith.addf %131, %132 : vector<8x8xf32>
    %cst_48 = arith.constant 0.000000e+00 : f32
    %134 = vector.broadcast %cst_48 : f32 to vector<8x8xf32>
    %135 = arith.cmpf ogt, %133, %134 : vector<8x8xf32>
    %cst_49 = arith.constant 2.000000e-01 : f32
    %136 = vector.broadcast %cst_49 : f32 to vector<8x8xf32>
    %137 = arith.mulf %136, %133 : vector<8x8xf32>
    %138 = arith.select %135, %133, %137 : vector<8x8xi1>, vector<8x8xf32>
    %139 = arith.addf %138, %1 : vector<8x8xf32>
    %cst_50 = arith.constant dense<0xFF800000> : vector<8xf32>
    %140 = vector.multi_reduction <maximumf>, %139, %cst_50 [1] : vector<8x8xf32> to vector<8xf32>
    %141 = vector.shape_cast %140 : vector<8xf32> to vector<8x1xf32>
    %142 = vector.broadcast %141 : vector<8x1xf32> to vector<8x8xf32>
    %143 = arith.subf %139, %142 : vector<8x8xf32>
    %144 = math.exp %143 : vector<8x8xf32>
    %cst_51 = arith.constant dense<0.000000e+00> : vector<8xf32>
    %145 = vector.multi_reduction <add>, %144, %cst_51 [1] : vector<8x8xf32> to vector<8xf32>
    %146 = vector.shape_cast %145 : vector<8xf32> to vector<8x1xf32>
    %147 = vector.broadcast %146 : vector<8x1xf32> to vector<8x8xf32>
    %148 = arith.divf %144, %147 : vector<8x8xf32>
    %149 = vector.extract_strided_slice %106 {offsets = [0, 2], sizes = [8, 1], strides = [1, 1]} : vector<8x4xf32> to vector<8x1xf32>
    %150 = vector.extract_strided_slice %108 {offsets = [2, 0], sizes = [1, 8], strides = [1, 1]} : vector<4x8xf32> to vector<1x8xf32>
    %151 = vector.broadcast %149 : vector<8x1xf32> to vector<8x8xf32>
    %152 = vector.broadcast %150 : vector<1x8xf32> to vector<8x8xf32>
    %153 = arith.addf %151, %152 : vector<8x8xf32>
    %cst_52 = arith.constant 0.000000e+00 : f32
    %154 = vector.broadcast %cst_52 : f32 to vector<8x8xf32>
    %155 = arith.cmpf ogt, %153, %154 : vector<8x8xf32>
    %cst_53 = arith.constant 2.000000e-01 : f32
    %156 = vector.broadcast %cst_53 : f32 to vector<8x8xf32>
    %157 = arith.mulf %156, %153 : vector<8x8xf32>
    %158 = arith.select %155, %153, %157 : vector<8x8xi1>, vector<8x8xf32>
    %159 = arith.addf %158, %1 : vector<8x8xf32>
    %cst_54 = arith.constant dense<0xFF800000> : vector<8xf32>
    %160 = vector.multi_reduction <maximumf>, %159, %cst_54 [1] : vector<8x8xf32> to vector<8xf32>
    %161 = vector.shape_cast %160 : vector<8xf32> to vector<8x1xf32>
    %162 = vector.broadcast %161 : vector<8x1xf32> to vector<8x8xf32>
    %163 = arith.subf %159, %162 : vector<8x8xf32>
    %164 = math.exp %163 : vector<8x8xf32>
    %cst_55 = arith.constant dense<0.000000e+00> : vector<8xf32>
    %165 = vector.multi_reduction <add>, %164, %cst_55 [1] : vector<8x8xf32> to vector<8xf32>
    %166 = vector.shape_cast %165 : vector<8xf32> to vector<8x1xf32>
    %167 = vector.broadcast %166 : vector<8x1xf32> to vector<8x8xf32>
    %168 = arith.divf %164, %167 : vector<8x8xf32>
    %169 = vector.extract_strided_slice %106 {offsets = [0, 3], sizes = [8, 1], strides = [1, 1]} : vector<8x4xf32> to vector<8x1xf32>
    %170 = vector.extract_strided_slice %108 {offsets = [3, 0], sizes = [1, 8], strides = [1, 1]} : vector<4x8xf32> to vector<1x8xf32>
    %171 = vector.broadcast %169 : vector<8x1xf32> to vector<8x8xf32>
    %172 = vector.broadcast %170 : vector<1x8xf32> to vector<8x8xf32>
    %173 = arith.addf %171, %172 : vector<8x8xf32>
    %cst_56 = arith.constant 0.000000e+00 : f32
    %174 = vector.broadcast %cst_56 : f32 to vector<8x8xf32>
    %175 = arith.cmpf ogt, %173, %174 : vector<8x8xf32>
    %cst_57 = arith.constant 2.000000e-01 : f32
    %176 = vector.broadcast %cst_57 : f32 to vector<8x8xf32>
    %177 = arith.mulf %176, %173 : vector<8x8xf32>
    %178 = arith.select %175, %173, %177 : vector<8x8xi1>, vector<8x8xf32>
    %179 = arith.addf %178, %1 : vector<8x8xf32>
    %cst_58 = arith.constant dense<0xFF800000> : vector<8xf32>
    %180 = vector.multi_reduction <maximumf>, %179, %cst_58 [1] : vector<8x8xf32> to vector<8xf32>
    %181 = vector.shape_cast %180 : vector<8xf32> to vector<8x1xf32>
    %182 = vector.broadcast %181 : vector<8x1xf32> to vector<8x8xf32>
    %183 = arith.subf %179, %182 : vector<8x8xf32>
    %184 = math.exp %183 : vector<8x8xf32>
    %cst_59 = arith.constant dense<0.000000e+00> : vector<8xf32>
    %185 = vector.multi_reduction <add>, %184, %cst_59 [1] : vector<8x8xf32> to vector<8xf32>
    %186 = vector.shape_cast %185 : vector<8xf32> to vector<8x1xf32>
    %187 = vector.broadcast %186 : vector<8x1xf32> to vector<8x8xf32>
    %188 = arith.divf %184, %187 : vector<8x8xf32>
    %189 = tpu.concatenate %128, %148, %168, %188 in 1 : vector<8x8xf32>, vector<8x8xf32>, vector<8x8xf32>, vector<8x8xf32> -> vector<8x32xf32>
    %190 = vector.shape_cast %104 : vector<8x64xf32> to vector<1x8x64xf32>
    %191 = vector.shape_cast %190 : vector<1x8x64xf32> to vector<1x8x64xf32>
    %192 = vector.broadcast %191 : vector<1x8x64xf32> to vector<4x8x64xf32>
    %193 = vector.shape_cast %192 : vector<4x8x64xf32> to vector<32x64xf32>
    %c0_60 = arith.constant 0 : index
    %c0_61 = arith.constant 0 : index
    %194 = vector.load %arg11[%c0_60, %c0_61] : memref<32x64xf32, #tpu.memory_space<vmem>>, vector<32x64xf32>
    %195 = arith.mulf %193, %194 : vector<32x64xf32>
    %cst_62 = arith.constant dense<0.000000e+00> : vector<32xf32>
    %196 = vector.multi_reduction <add>, %189, %cst_62 [0] : vector<8x32xf32> to vector<32xf32>
    %197 = vector.shape_cast %196 : vector<32xf32> to vector<1x32xf32>
    %cst_63 = arith.constant dense<0.000000e+00> : vector<1x64xf32>
    %198 = tpu.matmul %197, %195, %cst_63 {dimension_numbers = #tpu.dot_dimension_numbers<[1], [0], [0], [1], [0, 0, 1, 1], [], []>} : vector<1x32xf32>, vector<32x64xf32>, vector<1x64xf32> -> vector<1x64xf32>
    %c0_64 = arith.constant 0 : index
    %c0_65 = arith.constant 0 : index
    %199 = vector.load %arg12[%c0_64, %c0_65] : memref<1x64xf32, #tpu.memory_space<vmem>>, vector<1x64xf32>
    %cst_66 = arith.constant 8.000000e+00 : f32
    %200 = vector.broadcast %cst_66 : f32 to vector<1x64xf32>
    %201 = arith.mulf %200, %199 : vector<1x64xf32>
    %202 = arith.addf %198, %201 : vector<1x64xf32>
    %c0_67 = arith.constant 0 : index
    %c0_68 = arith.constant 0 : index
    %203 = vector.load %arg13[%c0_67, %c0_68] : memref<64x2xf32, #tpu.memory_space<vmem>>, vector<64x2xf32>
    %cst_69 = arith.constant dense<0.000000e+00> : vector<1x2xf32>
    %204 = tpu.matmul %202, %203, %cst_69 {dimension_numbers = #tpu.dot_dimension_numbers<[1], [0], [0], [1], [0, 0, 1, 1], [], []>} : vector<1x64xf32>, vector<64x2xf32>, vector<1x2xf32> -> vector<1x2xf32>
    %c0_70 = arith.constant 0 : index
    %c0_71 = arith.constant 0 : index
    %205 = vector.load %arg14[%c0_70, %c0_71] : memref<1x2xf32, #tpu.memory_space<vmem>>, vector<1x2xf32>
    %206 = arith.addf %204, %205 : vector<1x2xf32>
    %c0_72 = arith.constant 0 : index
    %c0_73 = arith.constant 0 : index
    %c0_74 = arith.constant 0 : index
    %207 = vector.load %arg15[%c0_72, %c0_73, %c0_74] : memref<1x1x2xf32, #tpu.memory_space<vmem>>, vector<1x1x2xf32>
    %208 = vector.shape_cast %207 : vector<1x1x2xf32> to vector<1x2xf32>
    %209 = vector.shape_cast %206 : vector<1x2xf32> to vector<1x1x2xf32>
    tpu.vector_store %arg15[%c0_72, %c0_73, %c0_74], %209 {strides = array<i32>} : memref<1x1x2xf32, #tpu.memory_space<vmem>>, vector<1x1x2xf32>,
    return
  }
  func.func @transform_0(%arg0: i32) -> (i32, i32, i32) {
    %c0_i32 = arith.constant 0 : i32
    %c0_i32_0 = arith.constant 0 : i32
    %c0_i32_1 = arith.constant 0 : i32
    return %arg0, %c0_i32, %c0_i32_0 : i32, i32, i32
  }
  func.func @transform_1(%arg0: i32) -> (i32, i32, i32) {
    %c0_i32 = arith.constant 0 : i32
    %c0_i32_0 = arith.constant 0 : i32
    %c0_i32_1 = arith.constant 0 : i32
    return %arg0, %c0_i32, %c0_i32_0 : i32, i32, i32
  }
  func.func @transform_2(%arg0: i32) -> (i32, i32) {
    %c0_i32 = arith.constant 0 : i32
    %c0_i32_0 = arith.constant 0 : i32
    %c0_i32_1 = arith.constant 0 : i32
    return %c0_i32, %c0_i32_0 : i32, i32
  }
  func.func @transform_3(%arg0: i32) -> (i32, i32) {
    %c0_i32 = arith.constant 0 : i32
    %c0_i32_0 = arith.constant 0 : i32
    %c0_i32_1 = arith.constant 0 : i32
    return %c0_i32, %c0_i32_0 : i32, i32
  }
  func.func @transform_4(%arg0: i32) -> (i32, i32) {
    %c0_i32 = arith.constant 0 : i32
    %c0_i32_0 = arith.constant 0 : i32
    %c0_i32_1 = arith.constant 0 : i32
    return %c0_i32, %c0_i32_0 : i32, i32
  }
  func.func @transform_5(%arg0: i32) -> (i32, i32) {
    %c0_i32 = arith.constant 0 : i32
    %c0_i32_0 = arith.constant 0 : i32
    %c0_i32_1 = arith.constant 0 : i32
    return %c0_i32, %c0_i32_0 : i32, i32
  }
  func.func @transform_6(%arg0: i32) -> (i32, i32) {
    %c0_i32 = arith.constant 0 : i32
    %c0_i32_0 = arith.constant 0 : i32
    %c0_i32_1 = arith.constant 0 : i32
    return %c0_i32, %c0_i32_0 : i32, i32
  }
  func.func @transform_7(%arg0: i32) -> (i32, i32) {
    %c0_i32 = arith.constant 0 : i32
    %c0_i32_0 = arith.constant 0 : i32
    %c0_i32_1 = arith.constant 0 : i32
    return %c0_i32, %c0_i32_0 : i32, i32
  }
  func.func @transform_8(%arg0: i32) -> (i32, i32) {
    %c0_i32 = arith.constant 0 : i32
    %c0_i32_0 = arith.constant 0 : i32
    %c0_i32_1 = arith.constant 0 : i32
    return %c0_i32, %c0_i32_0 : i32, i32
  }
  func.func @transform_9(%arg0: i32) -> (i32, i32) {
    %c0_i32 = arith.constant 0 : i32
    %c0_i32_0 = arith.constant 0 : i32
    %c0_i32_1 = arith.constant 0 : i32
    return %c0_i32, %c0_i32_0 : i32, i32
  }
  func.func @transform_10(%arg0: i32) -> (i32, i32) {
    %c0_i32 = arith.constant 0 : i32
    %c0_i32_0 = arith.constant 0 : i32
    %c0_i32_1 = arith.constant 0 : i32
    return %c0_i32, %c0_i32_0 : i32, i32
  }
  func.func @transform_11(%arg0: i32) -> (i32, i32) {
    %c0_i32 = arith.constant 0 : i32
    %c0_i32_0 = arith.constant 0 : i32
    %c0_i32_1 = arith.constant 0 : i32
    return %c0_i32, %c0_i32_0 : i32, i32
  }
  func.func @transform_12(%arg0: i32) -> (i32, i32) {
    %c0_i32 = arith.constant 0 : i32
    %c0_i32_0 = arith.constant 0 : i32
    %c0_i32_1 = arith.constant 0 : i32
    return %c0_i32, %c0_i32_0 : i32, i32
  }
  func.func @transform_13(%arg0: i32) -> (i32, i32) {
    %c0_i32 = arith.constant 0 : i32
    %c0_i32_0 = arith.constant 0 : i32
    %c0_i32_1 = arith.constant 0 : i32
    return %c0_i32, %c0_i32_0 : i32, i32
  }
  func.func @transform_14(%arg0: i32) -> (i32, i32, i32) {
    %c0_i32 = arith.constant 0 : i32
    %c0_i32_0 = arith.constant 0 : i32
    %c0_i32_1 = arith.constant 0 : i32
    return %arg0, %c0_i32, %c0_i32_0 : i32, i32, i32
  }
}

</mosaic_0001>

<bundles_post_ra>
// kernel: gat_classifier_forward.1
= control target key start
LH: loop header
LB: loop body
LE: loop exit
PB: predicated region body
PF: predicated region fallthrough
CT: control target
= control target key end

     0   :  { %s1294_s29 = smov 0   ;;  %s1570_s0 = inlined_call_operand.vmem [shape: f32[8,8,16], index: 0, kind: input, shape index: {}]   ;;  %s1571_s1 = inlined_call_operand.vmem [shape: f32[8,8,8], index: 1, kind: input, shape index: {}]   ;;  %s1572_s2 = inlined_call_operand.vmem [shape: f32[16,128], index: 2, kind: input, shape index: {}]   ;;  %s1573_s3 = inlined_call_operand.vmem [shape: f32[4,128], index: 3, kind: input, shape index: {}]   ;;  %s1574_s4 = inlined_call_operand.vmem [shape: f32[128,4], index: 4, kind: input, shape index: {}]   ;;  %s1575_s5 = inlined_call_operand.vmem [shape: f32[32,128], index: 5, kind: input, shape index: {}]   ;;  %s1576_s6 = inlined_call_operand.vmem [shape: f32[1,128], index: 6, kind: input, shape index: {}]   ;;  %s1577_s7 = inlined_call_operand.vmem [shape: f32[128,64], index: 7, kind: input, shape index: {}]   ;;  %s1578_s8 = inlined_call_operand.vmem [shape: f32[4,64], index: 8, kind: input, shape index: {}]   ;;  %s1579_s9 = inlined_call_operand.vmem [shape: f32[64,4], index: 9, kind: input, shape index: {}]   ;;  %s1580_s10 = inlined_call_operand.vmem [shape: f32[32,64], index: 10, kind: input, shape index: {}]   ;;  %s1581_s11 = inlined_call_operand.vmem [shape: f32[1,64], index: 11, kind: input, shape index: {}]   ;;  %s1582_s12 = inlined_call_operand.vmem [shape: f32[64,2], index: 12, kind: input, shape index: {}]   ;;  %s1583_s13 = inlined_call_operand.vmem [shape: f32[1,2], index: 13, kind: input, shape index: {}]   ;;  %s1584_s14 = inlined_call_operand.vmem [shape: f32[8,1,2], index: 14, kind: output, shape index: {}]  }
   0x1 LB: > { %s1131_s30 = sadd.s32 4294967295, %s1210_s29   ;;  %p1135_p0 = scmp.ge.s32.totalorder %s1210_s29, 1  ;;  %s1210_s29 = sphi %s1294_s29, %s24_s29  }
   0x2   : > { %p420_p1 = scmp.lt.s32.totalorder %s1210_s29, 9 }
   0x4   : > { %p421_p2 = pnand %p1135_p0, %p420_p1 }
   0x5   : > { %p467_p3 = scmp.lt.s32.totalorder (!%p421_p2), %s1131_s30, 7  ;;  %s1217_s15 = smov (!%p421_p2), 16  }
   0x6   : > { %424 = sbr.rel (%p421_p2) target bundleno = 1970 (0x7b2), region = 76 }
   0xb   : > { %v481_v0 = vld [vmem:[%s1572_s2 + $0x8] sm:$0xff]  ;;  %v480_v1 = vld [vmem:[%s1572_s2] sm:$0xff]  ;;  %v521_v2 = vld [vmem:[%s1574_s4 + $0x78] sm:$0xff]  ;;  %s1586_s30 = smov (!%p467_p3, %s1131_s30), 7  ;;  %vm482_vm0 = vcmask 130048   ;;  %v1212_v19 = vmov 3  }
   0xc   : > { %500 = vmatpush.msra.mxu3 %v481_v0  ;;  %522 = vmatpush.msra.mxu1 %v521_v2  ;;  %v520_v3 = vld [vmem:[%s1574_s4 + $0x70] sm:$0xff]  ;;  %v519_v4 = vld [vmem:[%s1574_s4 + $0x68] sm:$0xff]  ;;  %s1136_s25 = sshll.u32 %s1586_s30, 3  ;;  %v518_v5 = vld [vmem:[%s1574_s4 + $0x60] sm:$0xff]  ;;  %v1213_v20 = vmov 1   ;;  %v1214_v32 = vmov 0  }
   0xd   : > { %s470_s16 = scalar_lea.vmem %s1570_s0, %s1136_s25  ;;  %v517_v7 = vld [vmem:[%s1574_s4 + $0x58] sm:$0xff]  ;;  %v516_v8 = vld [vmem:[%s1574_s4 + $0x50] sm:$0xff]  ;;  %v515_v9 = vld [vmem:[%s1574_s4 + $0x48] sm:$0xff]  ;;  %1164 = vset.pattern.permute.xlu1 %v1212_v19  ;;  %1162 = vset.pattern.permute.xlu0 %v1213_v20  ;;  %v1215_v33 = vmov 2   ;;  %s474_s28 = scalar_lea.vmem %s1571_s1, %s1136_s25  ;;  %vm574_vm3 = vcmask 64512  }
   0xe   : > { %501 = vmatpush.msra.mxu3 %v480_v1  ;;  %523 = vmatpush.msra.mxu1 %v520_v3  ;;  %v479_v6 = vld [vmem:[%s470_s16] sm:$0xff]  ;;  %v513_v11 = vld [vmem:[%s1574_s4 + $0x38] sm:$0xff]  ;;  %v512_v12 = vld [vmem:[%s1574_s4 + $0x30] sm:$0xff]  ;;  %s1216_s25 = smov 8   ;;  %s1218_s16 = smov 24  }
   0xf   : > { %1138 = vmatmul.msk.f32.vlgmr.msra.gmra.mxu3 %vm482_vm0, %v479_v6  ;;  %v514_v10 = vld [vmem:[%s1574_s4 + $0x40] sm:$0xff]  ;;  %v511_v13 = vld [vmem:[%s1574_s4 + $0x28] sm:$0xff]  ;;  %v509_v15 = vld [vmem:[%s1574_s4 + $0x18] sm:$0xff]  ;;  %1166 = vset.pattern.permute.xlu2 %v1213_v20 }
  0x10   : > { %524 = vmatpush.msra.mxu1 %v519_v4  ;;  %v510_v14 = vld [vmem:[%s1574_s4 + $0x20] sm:$0xff]  ;;  %v508_v16 = vld [vmem:[%s1574_s4 + $0x10] sm:$0xff]  ;;  %v507_v17 = vld [vmem:[%s1574_s4 + $0x8] sm:$0xff] }
  0x11   : > { %v506_v18 = vld [vmem:[%s1574_s4] sm:$0xff]  ;;  %v720_v21 = vld [vmem:[%s1575_s5 + $0x18] sm:$0xff]  ;;  %v719_v23 = vld [vmem:[%s1575_s5 + $0x10] sm:$0xff] }
  0x12   : > { %525 = vmatpush.msra.mxu1 %v518_v5  ;;  %v542_v25 = vld [vmem:[%s1573_s3] sm:$0xf]  ;;  %v718_v26 = vld [vmem:[%s1575_s5 + $0x8] sm:$0xff] }
  0x13   : > { %v717_v28 = vld [vmem:[%s1575_s5] sm:$0xff] }
  0x14   : > { %526 = vmatpush.msra.mxu1 %v517_v7  ;;  %v1388_v41 = vld [vmem:[%s474_s28] sm:$0xff]  ;;  %s477_s28 = scalar_lea.vmem %s1584_s14, %s1586_s30 }
  0x16   : > { %527 = vmatpush.msra.mxu1 %v516_v8 }
  0x18   : > { %528 = vmatpush.msra.mxu1 %v515_v9 }
  0x1a   : > { %529 = vmatpush.msra.mxu1 %v514_v10 }
  0x1c   : > { %530 = vmatpush.msra.mxu1 %v513_v11 }
  0x1e   : > { %531 = vmatpush.msra.mxu1 %v512_v12 }
  0x20   : > { %532 = vmatpush.msra.mxu1 %v511_v13 }
  0x22   : > { %533 = vmatpush.msra.mxu1 %v510_v14 }
  0x24   : > { %534 = vmatpush.msra.mxu1 %v509_v15 }
  0x26   : > { %535 = vmatpush.msra.mxu1 %v508_v16 }
  0x28   : > { %536 = vmatpush.msra.mxu1 %v507_v17 }
  0x2a   : > { %537 = vmatpush.msra.mxu1 %v506_v18 }
  0x92   : > { %v503_v22 = vpop.f32.mrf.mxu3 }
  0x93   : > { %538 = vmatmul.f32.vlgmr.msra.gmra.mxu1 %v503_v22  ;;  %558 = vmatpush.xpose.msra.mxu2 %v503_v22  ;;  %v724_v24 = vmul.f32 %v720_v21, %v503_v22  ;;  %v723_v27 = vmul.f32 %v719_v23, %v503_v22  ;;  %v722_v29 = vmul.f32 %v718_v26, %v503_v22 }
  0x94   : > { %v721_v30 = vmul.f32 %v717_v28, %v503_v22 }
  0x95   : > { %745 = vmatpush.msrb.mxu3 %v724_v24 }
  0x96   : > { %559 = vmatmul.f32.vlgmr.msra.gmra.mxu2 %v542_v25 }
  0x97   : > { %746 = vmatpush.msrb.mxu3 %v723_v27 }
  0x99   : > { %747 = vmatpush.msrb.mxu3 %v722_v29 }
  0x9b   : > { %748 = vmatpush.msrb.mxu3 %v721_v30 }
 0x110   : > { %v539_v31 = vpop.f32.mrf.mxu1 }
 0x111   : > { %668 = vperm.xlu1 %1164, %v539_v31   ;;  %600 = vperm.xlu0 %1162, %v539_v31  }
 0x119   : > { %1165 = vset.pattern.permute.xlu1 %v1214_v32  ;;  %1163 = vset.pattern.permute.xlu0 %v1215_v33  ;;  %v560_v34 = vpop.f32.mrf.mxu2 }
 0x11a   : > { %565 = vperm.xlu1 %1165, %v539_v31   ;;  %634 = vperm.xlu0 %1163, %v539_v31   ;;  %v671_v35 = vperm.slane %v560_v34, 3  ;;  %v603_v36 = vperm.slane %v560_v34, 1  ;;  %v568_v49 = vperm.slane %v560_v34, 0  ;;  %v637_v51 = vperm.slane %v560_v34, 2 }
 0x122   : > { %1168 = vset.pattern.permute.xlu1 %v1212_v19  ;;  %1169 = vset.pattern.permute.xlu0 %v1214_v32 }
 0x183   : > { %v669_v37 = vpop.permute.xlu1 %668  ;;  %v601_v38 = vpop.permute.xlu0 %600 }
 0x184   : > { %v672_v39 = vadd.f32 %v671_v35, %v669_v37  ;;  %v604_v40 = vadd.f32 %v603_v36, %v601_v38 }
 0x186   : > { %vm673_vm1 = vcmp.gt.f32.partialorder %v672_v39, 0.0  ;;  %v674_v42 = vmul.f32 0.2, %v672_v39  ;;  %v606_v43 = vmul.f32 0.2, %v604_v40  ;;  %vm605_vm2 = vcmp.gt.f32.partialorder %v604_v40, 0.0 }
 0x188   : > { %v675_v44 = vsel %vm673_vm1, %v672_v39, %v674_v42  ;;  %v607_v45 = vsel %vm605_vm2, %v604_v40, %v606_v43 }
 0x189   : > { %v676_v46 = vadd.f32 %v675_v44, %v1388_v41  ;;  %v608_v47 = vadd.f32 %v607_v45, %v1388_v41 }
 0x18b   : > { %v677_v48 = vsel %vm574_vm3, %v676_v46, -inf  ;;  %v609_v50 = vsel %vm574_vm3, %v608_v47, -inf }
 0x18c   : > { %678 = vmax.xlane.f32.xlu1 %v677_v48  ;;  %v566_v52 = vpop.permute.xlu1 %565  ;;  %610 = vmax.xlane.f32.xlu2 %v609_v50  ;;  %v635_v53 = vpop.permute.xlu0 %634 }
 0x18d   : > { %v569_v54 = vadd.f32 %v568_v49, %v566_v52  ;;  %v638_v55 = vadd.f32 %v637_v51, %v635_v53 }
 0x18f   : > { %vm639_vm4 = vcmp.gt.f32.partialorder %v638_v55, 0.0  ;;  %v640_v56 = vmul.f32 0.2, %v638_v55  ;;  %v571_v57 = vmul.f32 0.2, %v569_v54  ;;  %vm570_vm5 = vcmp.gt.f32.partialorder %v569_v54, 0.0 }
 0x191   : > { %v641_v58 = vsel %vm639_vm4, %v638_v55, %v640_v56  ;;  %v572_v61 = vsel %vm570_vm5, %v569_v54, %v571_v57 }
 0x192   : > { %v642_v59 = vadd.f32 %v641_v58, %v1388_v41  ;;  %v573_v62 = vadd.f32 %v572_v61, %v1388_v41  ;;  %v768_v61 = vld [vmem:[%s1577_s7 + $0x70] sm:$0xff] }
 0x194   : > { %v643_v60 = vsel %vm574_vm3, %v642_v59, -inf  ;;  %v575_v63 = vsel %vm574_vm3, %v573_v62, -inf }
 0x195   : > { %644 = vmax.xlane.f32.xlu2 %v643_v60  ;;  %v769_v60 = vld [vmem:[%s1577_s7 + $0x78] sm:$0xff] }
 0x196   : > { %770 = vmatpush.msra.mxu0 %v769_v60 }
 0x198   : > { %771 = vmatpush.msra.mxu0 %v768_v61 }
 0x19d   : > { %576 = vmax.xlane.f32.xlu2 %v575_v63  ;;  %v767_v63 = vld [vmem:[%s1577_s7 + $0x68] sm:$0xff] }
 0x19e   : > { %772 = vmatpush.msra.mxu0 %v767_v63 }
 0x1ff   : > { %v611_v0 = vpop.xlane.xlu2 %610  ;;  %v679_v3 = vpop.xlane.xlu1 %678 }
 0x200   : > { %v612_v1 = vsub.f32 %v608_v47, %v611_v0  ;;  %v680_v7 = vsub.f32 %v676_v46, %v679_v3  ;;  %v766_v0 = vld [vmem:[%s1577_s7 + $0x60] sm:$0xff]  ;;  %v764_v3 = vld [vmem:[%s1577_s7 + $0x50] sm:$0xff] }
 0x201   : > { %773 = vmatpush.msra.mxu0 %v766_v0 }
 0x202   : > { %v613_v2 = vmul.f32 1.442695, %v612_v1  ;;  %v681_v10 = vmul.f32 1.442695, %v680_v7 }
 0x204   : > { %1172 = vpow2.f32 %v613_v2  ;;  %v765_v2 = vld [vmem:[%s1577_s7 + $0x58] sm:$0xff] }
 0x205   : > { %774 = vmatpush.msra.mxu0 %v765_v2 }
 0x207   : > { %775 = vmatpush.msra.mxu0 %v764_v3 }
 0x208   : > { %v645_v4 = vpop.xlane.xlu2 %644 }
 0x209   : > { %v646_v5 = vsub.f32 %v642_v59, %v645_v4 }
 0x20a   : > { %v1173_v6 = vpop.eup %1172 }
 0x20b   : > { %v647_v8 = vmul.f32 1.442695, %v646_v5  ;;  %v615_v9 = vsel %vm574_vm3, %v1173_v6, 0.0  ;;  %v763_v5 = vld [vmem:[%s1577_s7 + $0x48] sm:$0xff] }
 0x20c   : > { %616 = vadd.xlane.f32.xlu0 %v615_v9  ;;  %776 = vmatpush.msra.mxu0 %v763_v5  ;;  %v760_v9 = vld [vmem:[%s1577_s7 + $0x30] sm:$0xff] }
 0x20d   : > { %1174 = vpow2.f32 %v647_v8  ;;  %v761_v8 = vld [vmem:[%s1577_s7 + $0x38] sm:$0xff] }
 0x20e   : > { %1176 = vpow2.f32 %v681_v10 }
 0x210   : > { %v577_v11 = vpop.xlane.xlu2 %576 }
 0x211   : > { %v578_v13 = vsub.f32 %v573_v62, %v577_v11 }
 0x213   : > { %v1175_v12 = vpop.eup %1174  ;;  %v579_v15 = vmul.f32 1.442695, %v578_v13 }
 0x214   : > { %v649_v14 = vsel %vm574_vm3, %v1175_v12, 0.0  ;;  %v1177_v16 = vpop.eup %1176 }
 0x215   : > { %650 = vadd.xlane.f32.xlu2 %v649_v14  ;;  %1178 = vpow2.f32 %v579_v15  ;;  %v683_v17 = vsel %vm574_vm3, %v1177_v16, 0.0  ;;  %v758_v14 = vld [vmem:[%s1577_s7 + $0x20] sm:$0xff] }
 0x21b   : > { %v1401_v18 = vpop.eup %1178 }
 0x21c   : > { %v581_v20 = vsel %vm574_vm3, %v1401_v18, 0.0 }
 0x21d   : > { %684 = vadd.xlane.f32.xlu2 %v683_v17  ;;  %v757_v17 = vld [vmem:[%s1577_s7 + $0x18] sm:$0xff] }
 0x225   : > { %582 = vadd.xlane.f32.xlu2 %v581_v20 }
 0x27f   : > { %v617_v21 = vpop.xlane.xlu0 %616 }
 0x280   : > { %1180 = vrcp.f32 %v617_v21  ;;  %v629_v26 = vand.u32 2147483648, %v617_v21  ;;  %v627_v28 = vand.u32 2147483647, %v617_v21  ;;  %vm623_vm7 = vweird.f32 %v617_v21 }
 0x282   : > { %v630_v31 = vor.u32 1.1754944e-38, %v629_v26  ;;  %vm628_vm9 = vcmp.eq.f32.partialorder %v627_v28, 8.507059e+37  ;;  %v756_v28 = vld [vmem:[%s1577_s7 + $0x10] sm:$0xff] }
 0x286   : > { %v1181_v22 = vpop.eup %1180 }
 0x287   : > { %v619_v23 = vmul.f32 %v1181_v22, %v617_v21  ;;  %vm624_vm6 = vweird.f32 %v1181_v22 }
 0x288   : > { %v651_v24 = vpop.xlane.xlu2 %650  ;;  %vm625_vm8 = vmor %vm623_vm7, %vm624_vm6 }
 0x289   : > { %1182 = vrcp.f32 %v651_v24  ;;  %v620_v25 = vsub.f32 1.0, %v619_v23  ;;  %v663_v40 = vand.u32 2147483648, %v651_v24  ;;  %v661_v42 = vand.u32 2147483647, %v651_v24 }
 0x28a   : > { %vm657_vm11 = vweird.f32 %v651_v24 }
 0x28b   : > { %v621_v27 = vmul.f32 %v1181_v22, %v620_v25  ;;  %v664_v45 = vor.u32 1.1754944e-38, %v663_v40  ;;  %vm662_vm13 = vcmp.eq.f32.partialorder %v661_v42, 8.507059e+37 }
 0x28d   : > { %v622_v29 = vadd.f32 %v1181_v22, %v621_v27 }
 0x28f   : > { %v1183_v30 = vpop.eup %1182  ;;  %v626_v35 = vsel %vm625_vm8, %v1181_v22, %v622_v29  ;;  %vm715_vm8 = vcmask 195584   ;;  %v754_v29 = vld [vmem:[%s1577_s7] sm:$0xff] }
 0x290   : > { %v653_v32 = vmul.f32 %v1183_v30, %v651_v24  ;;  %v685_v34 = vpop.xlane.xlu2 %684  ;;  %v631_v36 = vsel %vm628_vm9, %v630_v31, %v626_v35  ;;  %vm658_vm10 = vweird.f32 %v1183_v30  ;;  %vm729_vm9 = vcmask 261120   ;;  %v796_v31 = vld [vmem:[%s1579_s9 + $0x30] sm:$0xff]  ;;  %v793_v35 = vld [vmem:[%s1579_s9 + $0x18] sm:$0xff] }
 0x291   : > { %1184 = vrcp.f32 %v685_v34  ;;  %v632_v38 = vmul.f32 %v1173_v6, %v631_v36  ;;  %vm659_vm12 = vmor %vm657_vm11, %vm658_vm10  ;;  %v697_v50 = vand.u32 2147483648, %v685_v34  ;;  %v695_v53 = vand.u32 2147483647, %v685_v34  ;;  %v762_v6 = vld [vmem:[%s1577_s7 + $0x40] sm:$0xff]  ;;  %v792_v36 = vld [vmem:[%s1579_s9 + $0x10] sm:$0xff] }
 0x292   : > { %v654_v37 = vsub.f32 1.0, %v653_v32  ;;  %vm691_vm15 = vweird.f32 %v685_v34  ;;  %777 = vmatpush.msra.mxu0 %v762_v6  ;;  %v795_v32 = vld [vmem:[%s1579_s9 + $0x28] sm:$0xff]  ;;  %vm798_vm10 = vcmask 523264  }
 0x293   : > { %702 = vrot.lane.b32.xlu2 %v632_v38, %s1216_s25  ;;  %v698_v55 = vor.u32 1.1754944e-38, %v697_v50  ;;  %vm696_vm2 = vcmp.eq.f32.partialorder %v695_v53, 8.507059e+37  ;;  %v1171_v38 = vld [vmem:[%s1576_s6] ss:$0 sm:$0xff] }
 0x294   : > { %v655_v39 = vmul.f32 %v1183_v30, %v654_v37  ;;  %778 = vmatpush.msra.mxu0 %v761_v8  ;;  %v791_v37 = vld [vmem:[%s1579_s9 + $0x8] sm:$0xff] }
 0x296   : > { %v656_v43 = vadd.f32 %v1183_v30, %v655_v39  ;;  %779 = vmatpush.msra.mxu0 %v760_v9 }
 0x297   : > { %v1185_v44 = vpop.eup %1184 }
 0x298   : > { %v687_v46 = vmul.f32 %v1185_v44, %v685_v34  ;;  %v660_v47 = vsel %vm659_vm12, %v1183_v30, %v656_v43  ;;  %vm692_vm14 = vweird.f32 %v1185_v44  ;;  %v583_v59 = vpop.xlane.xlu2 %582  ;;  %v797_v30 = vld [vmem:[%s1579_s9 + $0x38] sm:$0xff]  ;;  %v794_v34 = vld [vmem:[%s1579_s9 + $0x20] sm:$0xff] }
 0x299   : > { %v665_v49 = vsel %vm662_vm13, %v664_v45, %v660_v47  ;;  %vm693_vm1 = vmor %vm691_vm15, %vm692_vm14  ;;  %1186 = vrcp.f32 %v583_v59  ;;  %v595_v11 = vand.u32 2147483648, %v583_v59  ;;  %vm589_vm5 = vweird.f32 %v583_v59  ;;  %810 = vmatpush.msrb.mxu2 %v797_v30  ;;  %v790_v43 = vld [vmem:[%s1579_s9] sm:$0xff] }
 0x29a   : > { %v688_v48 = vsub.f32 1.0, %v687_v46  ;;  %v666_v51 = vmul.f32 %v1175_v12, %v665_v49  ;;  %v759_v12 = vld [vmem:[%s1577_s7 + $0x28] sm:$0xff]  ;;  %v593_v13 = vand.u32 2147483647, %v583_v59  ;;  %v1000_v46 = vld [vmem:[%s1580_s10 + $0x10] sm:$0xff] }
 0x29b   : > { %780 = vmatpush.msra.mxu0 %v759_v12  ;;  %811 = vmatpush.msrb.mxu2 %v796_v31  ;;  %v999_v49 = vld [vmem:[%s1580_s10 + $0x8] sm:$0xff] }
 0x29c   : > { %v689_v52 = vmul.f32 %v1185_v44, %v688_v48  ;;  %706 = vrot.lane.b32.xlu1 %v666_v51, %s1217_s15  ;;  %vm594_vm7 = vcmp.eq.f32.partialorder %v593_v13, 8.507059e+37  ;;  %v822_v48 = vld [vmem:[%s1578_s8] sm:$0xf] }
 0x29d   : > { %781 = vmatpush.msra.mxu0 %v758_v14  ;;  %812 = vmatpush.msrb.mxu2 %v795_v32  ;;  %v998_v51 = vld [vmem:[%s1580_s10] sm:$0xff] }
 0x29e   : > { %v690_v54 = vadd.f32 %v1185_v44, %v689_v52 }
 0x29f   : > { %v1187_v62 = vpop.eup %1186  ;;  %782 = vmatpush.msra.mxu0 %v757_v17  ;;  %813 = vmatpush.msrb.mxu2 %v794_v34 }
 0x2a0   : > { %v694_v56 = vsel %vm693_vm1, %v1185_v44, %v690_v54  ;;  %v585_v1 = vmul.f32 %v1187_v62, %v583_v59  ;;  %vm590_vm4 = vweird.f32 %v1187_v62  ;;  %v1001_v44 = vld [vmem:[%s1580_s10 + $0x18] sm:$0xff] }
 0x2a1   : > { %v699_v57 = vsel %vm696_vm2, %v698_v55, %v694_v56  ;;  %vm591_vm6 = vmor %vm589_vm5, %vm590_vm4  ;;  %783 = vmatpush.msra.mxu0 %v756_v28  ;;  %814 = vmatpush.msrb.mxu2 %v793_v35 }
 0x2a2   : > { %v700_v58 = vmul.f32 %v1177_v16, %v699_v57  ;;  %v586_v4 = vsub.f32 1.0, %v585_v1  ;;  %v596_v16 = vor.u32 1.1754944e-38, %v595_v11 }
 0x2a3   : > { %815 = vmatpush.msrb.mxu2 %v792_v36 }
 0x2a4   : > { %710 = vrot.lane.b32.xlu0 %v700_v58, %s1218_s16  ;;  %v587_v7 = vmul.f32 %v1187_v62, %v586_v4 }
 0x2a5   : > { %816 = vmatpush.msrb.mxu2 %v791_v37 }
 0x2a6   : > { %v588_v10 = vadd.f32 %v1187_v62, %v587_v7 }
 0x2a7   : > { %817 = vmatpush.msrb.mxu2 %v790_v43 }
 0x2a8   : > { %v592_v15 = vsel %vm591_vm6, %v1187_v62, %v588_v10 }
 0x2a9   : > { %v597_v20 = vsel %vm594_vm7, %v596_v16, %v592_v15 }
 0x2aa   : > { %v598_v22 = vmul.f32 %v1401_v18, %v597_v20  ;;  %v755_v18 = vld [vmem:[%s1577_s7 + $0x8] sm:$0xff] }
 0x2ab   : > { %784 = vmatpush.msra.mxu0 %v755_v18 }
 0x2ad   : > { %785 = vmatpush.msra.mxu0 %v754_v29 }
 0x2ed   : > { %v703_v21 = vpop.permute.xlu2 %702 }
 0x2ee   : > { %v713_v24 = vsel %vm574_vm3, %v598_v22, %v703_v21 }
 0x30e   : > { %v707_v23 = vpop.permute.xlu1 %706 }
 0x30f   : > { %v714_v25 = vsel %vm482_vm0, %v713_v24, %v707_v23 }
 0x316   : > { %v711_v26 = vpop.permute.xlu0 %710 }
 0x317   : > { %v716_v27 = vsel %vm715_vm8, %v714_v25, %v711_v26 }
 0x318   : > { %1139 = vmatmul.msk.f32.vlgmr.msrb.gmra.mxu3 %vm729_vm9, %v716_v27 }
 0x39b   : > { %v750_v39 = vpop.f32.mrf.mxu3 }
 0x39c   : > { %v751_v40 = vadd.f32 %v1171_v38, %v750_v39 }
 0x39e   : > { %v753_v42 = vmax.f32 %v751_v40, 0.0 }
 0x3a0   : > { %786 = vmatmul.f32.vlgmr.msra.gmra.mxu0 %v753_v42 }
 0x41d   : > { %v787_v45 = vpop.f32.mrf.mxu0 }
 0x41e   : > { %1140 = vmatmul.msk.f32.vlgmr.msrb.gmra.mxu2 %vm798_vm10, %v787_v45  ;;  %1141 = vmatpush.xpose.msk.msra.mxu3 %vm798_vm10, %v787_v45  ;;  %v1005_v47 = vmul.f32 %v1001_v44, %v787_v45  ;;  %v1004_v50 = vmul.f32 %v1000_v46, %v787_v45  ;;  %v1003_v52 = vmul.f32 %v999_v49, %v787_v45 }
 0x41f   : > { %v1002_v53 = vmul.f32 %v998_v51, %v787_v45 }
 0x421   : > { %1142 = vmatmul.msk.f32.vlgmr.msra.gmra.mxu3 %vm798_vm10, %v822_v48 }
 0x422   : > { %1030 = vmatpush.msrb.mxu3 %v1005_v47 }
 0x424   : > { %1031 = vmatpush.msrb.mxu3 %v1004_v50 }
 0x426   : > { %1032 = vmatpush.msrb.mxu3 %v1003_v52 }
 0x428   : > { %1033 = vmatpush.msrb.mxu3 %v1002_v53 }
 0x4a1   : > { %v819_v54 = vpop.f32.mrf.mxu2 }
 0x4a2   : > { %848 = vperm.xlu0 %1169, %v819_v54   ;;  %950 = vperm.xlu1 %1168, %v819_v54  }
 0x4a3   : > { %882 = vperm.xlu2 %1166, %v819_v54  }
 0x4a4   : > { %v843_v55 = vpop.f32.mrf.mxu3 }
 0x4a5   : > { %v885_v56 = vperm.slane %v843_v55, 1  ;;  %v919_v62 = vperm.slane %v843_v55, 2  ;;  %v851_v4 = vperm.slane %v843_v55, 0  ;;  %v953_v5 = vperm.slane %v843_v55, 3 }
 0x4aa   : > { %1170 = vset.pattern.permute.xlu0 %v1212_v19 }
 0x4ab   : > { %1167 = vset.pattern.permute.xlu2 %v1215_v33 }
 0x4ac   : > { %916 = vperm.xlu2 %1167, %v819_v54  }
 0x4fd   : > { %v883_v57 = vpop.permute.xlu2 %882 }
 0x4fe   : > { %v886_v58 = vadd.f32 %v885_v56, %v883_v57 }
 0x500   : > { %vm887_vm11 = vcmp.gt.f32.partialorder %v886_v58, 0.0  ;;  %v888_v59 = vmul.f32 0.2, %v886_v58 }
 0x502   : > { %v889_v60 = vsel %vm887_vm11, %v886_v58, %v888_v59 }
 0x503   : > { %v890_v61 = vadd.f32 %v889_v60, %v1388_v41 }
 0x505   : > { %v891_v63 = vsel %vm574_vm3, %v890_v61, -inf }
 0x506   : > { %892 = vmax.xlane.f32.xlu2 %v891_v63  ;;  %v917_v0 = vpop.permute.xlu2 %916 }
 0x507   : > { %v920_v1 = vadd.f32 %v919_v62, %v917_v0 }
 0x509   : > { %vm921_vm12 = vcmp.gt.f32.partialorder %v920_v1, 0.0  ;;  %v922_v19 = vmul.f32 0.2, %v920_v1 }
 0x50b   : > { %v923_v2 = vsel %vm921_vm12, %v920_v1, %v922_v19 }
 0x50c   : > { %v924_v33 = vadd.f32 %v923_v2, %v1388_v41 }
 0x50e   : > { %v925_v3 = vsel %vm574_vm3, %v924_v33, -inf }
 0x50f   : > { %926 = vmax.xlane.f32.xlu1 %v925_v3 }
 0x514   : > { %v849_v6 = vpop.permute.xlu0 %848  ;;  %v951_v7 = vpop.permute.xlu1 %950 }
 0x515   : > { %v852_v8 = vadd.f32 %v851_v4, %v849_v6  ;;  %v954_v9 = vadd.f32 %v953_v5, %v951_v7 }
 0x517   : > { %vm853_vm13 = vcmp.gt.f32.partialorder %v852_v8, 0.0  ;;  %v854_v10 = vmul.f32 0.2, %v852_v8  ;;  %vm955_vm14 = vcmp.gt.f32.partialorder %v954_v9, 0.0  ;;  %v956_v11 = vmul.f32 0.2, %v954_v9 }
 0x519   : > { %v957_v12 = vsel %vm955_vm14, %v954_v9, %v956_v11  ;;  %v855_v13 = vsel %vm853_vm13, %v852_v8, %v854_v10 }
 0x51a   : > { %v958_v14 = vadd.f32 %v957_v12, %v1388_v41  ;;  %v856_v15 = vadd.f32 %v855_v13, %v1388_v41 }
 0x51c   : > { %v959_v16 = vsel %vm574_vm3, %v958_v14, -inf  ;;  %v857_v17 = vsel %vm574_vm3, %v856_v15, -inf }
 0x51d   : > { %960 = vmax.xlane.f32.xlu0 %v959_v16  ;;  %858 = vmax.xlane.f32.xlu2 %v857_v17  ;;  %v1044_v16 = vld [vmem:[%s1582_s12 + $0x30] sm:$0xff]  ;;  %v1043_v17 = vld [vmem:[%s1582_s12 + $0x28] sm:$0xff] }
 0x579   : > { %v893_v20 = vpop.xlane.xlu2 %892 }
 0x57a   : > { %v894_v21 = vsub.f32 %v890_v61, %v893_v20 }
 0x57c   : > { %v895_v22 = vmul.f32 1.442695, %v894_v21  ;;  %v1042_v21 = vld [vmem:[%s1582_s12 + $0x20] sm:$0xff] }
 0x57e   : > { %1188 = vpow2.f32 %v895_v22 }
 0x582   : > { %v927_v23 = vpop.xlane.xlu1 %926 }
 0x583   : > { %v928_v24 = vsub.f32 %v924_v33, %v927_v23 }
 0x584   : > { %v1189_v25 = vpop.eup %1188 }
 0x585   : > { %v929_v26 = vmul.f32 1.442695, %v928_v24  ;;  %v897_v27 = vsel %vm574_vm3, %v1189_v25, 0.0  ;;  %v1041_v24 = vld [vmem:[%s1582_s12 + $0x18] sm:$0xff] }
 0x586   : > { %898 = vadd.xlane.f32.xlu1 %v897_v27 }
 0x587   : > { %1190 = vpow2.f32 %v929_v26  ;;  %v1040_v26 = vld [vmem:[%s1582_s12 + $0x10] sm:$0xff] }
 0x58d   : > { %v1191_v28 = vpop.eup %1190 }
 0x58e   : > { %v931_v41 = vsel %vm574_vm3, %v1191_v28, 0.0 }
 0x58f   : > { %932 = vadd.xlane.f32.xlu2 %v931_v41 }
 0x590   : > { %v961_v18 = vpop.xlane.xlu0 %960  ;;  %v859_v29 = vpop.xlane.xlu2 %858 }
 0x591   : > { %v962_v30 = vsub.f32 %v958_v14, %v961_v18  ;;  %v860_v31 = vsub.f32 %v856_v15, %v859_v29  ;;  %v1045_v15 = vld [vmem:[%s1582_s12 + $0x38] sm:$0xff] }
 0x592   : > { %1058 = vmatpush.msra.mxu2 %v1045_v15 }
 0x593   : > { %v963_v32 = vmul.f32 1.442695, %v962_v30  ;;  %v861_v34 = vmul.f32 1.442695, %v860_v31 }
 0x594   : > { %1059 = vmatpush.msra.mxu2 %v1044_v16 }
 0x595   : > { %1192 = vpow2.f32 %v963_v32 }
 0x596   : > { %1194 = vpow2.f32 %v861_v34  ;;  %1060 = vmatpush.msra.mxu2 %v1043_v17 }
 0x598   : > { %1061 = vmatpush.msra.mxu2 %v1042_v21 }
 0x59a   : > { %1062 = vmatpush.msra.mxu2 %v1041_v24 }
 0x59b   : > { %v1193_v35 = vpop.eup %1192 }
 0x59c   : > { %v1518_v36 = vpop.eup %1194  ;;  %v965_v37 = vsel %vm574_vm3, %v1193_v35, 0.0  ;;  %1063 = vmatpush.msra.mxu2 %v1040_v26 }
 0x59d   : > { %966 = vadd.xlane.f32.xlu1 %v965_v37  ;;  %v863_v38 = vsel %vm574_vm3, %v1518_v36, 0.0 }
 0x59e   : > { %864 = vadd.xlane.f32.xlu0 %v863_v38 }
 0x5f9   : > { %v899_v39 = vpop.xlane.xlu1 %898 }
 0x5fa   : > { %1196 = vrcp.f32 %v899_v39  ;;  %v911_v45 = vand.u32 2147483648, %v899_v39  ;;  %v909_v47 = vand.u32 2147483647, %v899_v39  ;;  %vm905_vm1 = vweird.f32 %v899_v39 }
 0x5fc   : > { %v912_v49 = vor.u32 1.1754944e-38, %v911_v45  ;;  %vm910_vm4 = vcmp.eq.f32.partialorder %v909_v47, 8.507059e+37  ;;  %v1013_v45 = vld [vmem:[%s1581_s11] sm:$0x1] }
 0x600   : > { %v1197_v40 = vpop.eup %1196 }
 0x601   : > { %v901_v42 = vmul.f32 %v1197_v40, %v899_v39  ;;  %vm906_vm15 = vweird.f32 %v1197_v40 }
 0x602   : > { %v933_v43 = vpop.xlane.xlu2 %932  ;;  %vm907_vm2 = vmor %vm905_vm1, %vm906_vm15 }
 0x603   : > { %v902_v44 = vsub.f32 1.0, %v901_v42  ;;  %1198 = vrcp.f32 %v933_v43  ;;  %v945_v57 = vand.u32 2147483648, %v933_v43  ;;  %v943_v58 = vand.u32 2147483647, %v933_v43 }
 0x604   : > { %vm939_vm6 = vweird.f32 %v933_v43 }
 0x605   : > { %v903_v46 = vmul.f32 %v1197_v40, %v902_v44  ;;  %v946_v61 = vor.u32 1.1754944e-38, %v945_v57  ;;  %vm944_vm11 = vcmp.eq.f32.partialorder %v943_v58, 8.507059e+37  ;;  %v1038_v44 = vld [vmem:[%s1582_s12] sm:$0xff] }
 0x607   : > { %v904_v48 = vadd.f32 %v1197_v40, %v903_v46  ;;  %v1014_v46 = vmul.f32 8.0, %v1013_v45 }
 0x609   : > { %v1199_v50 = vpop.eup %1198  ;;  %v908_v51 = vsel %vm907_vm2, %v1197_v40, %v904_v48 }
 0x60a   : > { %v935_v52 = vmul.f32 %v1199_v50, %v933_v43  ;;  %v913_v53 = vsel %vm910_vm4, %v912_v49, %v908_v51  ;;  %vm940_vm5 = vweird.f32 %v1199_v50  ;;  %v1046_v49 = vld [vmem:[%s1583_s13] sm:$0x1] }
 0x60b   : > { %v914_v54 = vmul.f32 %v1189_v25, %v913_v53  ;;  %vm941_vm7 = vmor %vm939_vm6, %vm940_vm5 }
 0x60c   : > { %v936_v55 = vsub.f32 1.0, %v935_v52 }
 0x60d   : > { %984 = vrot.lane.b32.xlu2 %v914_v54, %s1216_s25 }
 0x60e   : > { %v937_v56 = vmul.f32 %v1199_v50, %v936_v55 }
 0x610   : > { %v967_v59 = vpop.xlane.xlu1 %966  ;;  %v938_v60 = vadd.f32 %v1199_v50, %v937_v56 }
 0x611   : > { %1200 = vrcp.f32 %v967_v59  ;;  %v979_v33 = vand.u32 2147483648, %v967_v59  ;;  %v977_v4 = vand.u32 2147483647, %v967_v59  ;;  %vm973_vm13 = vweird.f32 %v967_v59  ;;  %v865_v10 = vpop.xlane.xlu0 %864 }
 0x612   : > { %v942_v62 = vsel %vm941_vm7, %v1199_v50, %v938_v60  ;;  %1202 = vrcp.f32 %v865_v10  ;;  %v877_v22 = vand.u32 2147483648, %v865_v10  ;;  %vm871_vm2 = vweird.f32 %v865_v10 }
 0x613   : > { %v947_v63 = vsel %vm944_vm11, %v946_v61, %v942_v62  ;;  %v980_v6 = vor.u32 1.1754944e-38, %v979_v33  ;;  %vm978_vm15 = vcmp.eq.f32.partialorder %v977_v4, 8.507059e+37  ;;  %v875_v23 = vand.u32 2147483647, %v865_v10 }
 0x614   : > { %v948_v0 = vmul.f32 %v1191_v28, %v947_v63  ;;  %v878_v27 = vor.u32 1.1754944e-38, %v877_v22 }
 0x615   : > { %vm876_vm5 = vcmp.eq.f32.partialorder %v875_v23, 8.507059e+37 }
 0x616   : > { %988 = vrot.lane.b32.xlu1 %v948_v0, %s1217_s15 }
 0x617   : > { %v1201_v1 = vpop.eup %1200 }
 0x618   : > { %v969_v19 = vmul.f32 %v1201_v1, %v967_v59  ;;  %vm974_vm12 = vweird.f32 %v1201_v1  ;;  %v1203_v11 = vpop.eup %1202 }
 0x619   : > { %vm975_vm14 = vmor %vm973_vm13, %vm974_vm12  ;;  %v867_v12 = vmul.f32 %v1203_v11, %v865_v10  ;;  %vm872_vm1 = vweird.f32 %v1203_v11 }
 0x61a   : > { %v970_v2 = vsub.f32 1.0, %v969_v19  ;;  %vm873_vm4 = vmor %vm871_vm2, %vm872_vm1 }
 0x61b   : > { %v868_v13 = vsub.f32 1.0, %v867_v12 }
 0x61c   : > { %v971_v3 = vmul.f32 %v1201_v1, %v970_v2 }
 0x61d   : > { %v869_v14 = vmul.f32 %v1203_v11, %v868_v13 }
 0x61e   : > { %v972_v5 = vadd.f32 %v1201_v1, %v971_v3 }
 0x61f   : > { %v870_v20 = vadd.f32 %v1203_v11, %v869_v14 }
 0x620   : > { %v976_v7 = vsel %vm975_vm14, %v1201_v1, %v972_v5 }
 0x621   : > { %v981_v8 = vsel %vm978_vm15, %v980_v6, %v976_v7  ;;  %v874_v25 = vsel %vm873_vm4, %v1203_v11, %v870_v20 }
 0x622   : > { %v982_v9 = vmul.f32 %v1193_v35, %v981_v8  ;;  %v879_v28 = vsel %vm876_vm5, %v878_v27, %v874_v25 }
 0x623   : > { %v880_v18 = vmul.f32 %v1518_v36, %v879_v28  ;;  %v1039_v36 = vld [vmem:[%s1582_s12 + $0x8] sm:$0xff] }
 0x624   : > { %992 = vrot.lane.b32.xlu0 %v982_v9, %s1218_s16  ;;  %1064 = vmatpush.msra.mxu2 %v1039_v36 }
 0x626   : > { %1065 = vmatpush.msra.mxu2 %v1038_v44 }
 0x667   : > { %v985_v41 = vpop.permute.xlu2 %984 }
 0x668   : > { %v995_v30 = vsel %vm574_vm3, %v880_v18, %v985_v41 }
 0x688   : > { %v989_v29 = vpop.permute.xlu1 %988 }
 0x689   : > { %v996_v31 = vsel %vm482_vm0, %v995_v30, %v989_v29  ;;  %vm1070_vm0 = vcmask 8192  }
 0x696   : > { %v993_v32 = vpop.permute.xlu0 %992 }
 0x697   : > { %v997_v34 = vsel %vm715_vm8, %v996_v31, %v993_v32 }
 0x698   : > { %v1006_v35 = vsel %vm729_vm9, %v997_v34, 0.0 }
 0x699   : > { %v1007_v37 = vrot.slane %v1006_v35, 4 }
 0x69b   : > { %v1008_v38 = vadd.f32 %v1007_v37, %v1006_v35 }
 0x69d   : > { %v1009_v39 = vrot.slane %v1008_v38, 2 }
 0x69f   : > { %v1010_v40 = vadd.f32 %v1009_v39, %v1008_v38 }
 0x6a1   : > { %v1011_v42 = vrot.slane %v1010_v40, 1 }
 0x6a3   : > { %v1012_v43 = vadd.f32 %v1011_v42, %v1010_v40 }
 0x6a5   : > { %1143 = vmatmul.msk.f32.vlgmr.msrb.gmra.mxu3 %vm729_vm9, %v1012_v43 }
 0x728   : > { %v1035_v47 = vpop.f32.mrf.mxu3 }
 0x729   : > { %v1036_v48 = vadd.f32 %v1035_v47, %v1014_v46 }
 0x72b   : > { %1144 = vmatmul.msk.f32.vlgmr.msra.gmra.mxu2 %vm798_vm10, %v1036_v48 }
 0x7ae   : > { %v1067_v50 = vpop.f32.mrf.mxu2 }
 0x7af   : > { %v1068_v51 = vadd.f32 %v1067_v50, %v1046_v49 }
 0x7b1   : > { %1071 = vst.msk [vmem:[%s477_s28] sm:$0x1] %vm1070_vm0, %v1068_v51 }
 0x7b2 PF: > { %s24_s29 = sadd.s32 1, %s1210_s29  }
 0x7b3   : > { %p21_p4 = scmp.ge.s32.totalorder %s24_s29, 10  }
 0x7b5   :  { %23 = sbr.rel (!%p21_p4) target bundleno = 1 (0x1), region = 109 }

</bundles_post_ra>
